<compile_context>
chip_gen: v6e
topology: v6e:2x2x1
jax: 0.10.0
libtpu: 0.0.40
codegen_flags: <defaults>
</compile_context>

<pallas_src>
import functools

import jax
import jax.numpy as jnp
from jax.experimental import pallas as pl
from jax.experimental.pallas import tpu as pltpu


def make_policy_kernel(hidden_size: int, num_actions: int):
    H, A = hidden_size, num_actions

    def policy_kernel(x_ref, p_ref, out_ref):
        # x_ref:  (1, TBL)   states, batch on lanes
        # p_ref:  (Rp, 128)  packed params (lane-dense, single resident DMA)
        #   col 0        -> w1 (H,)
        #   col 1        -> b1 (H,)
        #   col 2        -> b2 (A,)
        #   cols 8:8+A   -> w2 (H, A)
        # out_ref: (A, TBL)  action probabilities, batch on lanes (lane-dense store)
        x = x_ref[...]                                   # (1, TBL)
        p = p_ref[...]                                   # (Rp, 128), loaded once
        w1c = p[:H, 0:1]                                 # (H, 1)
        b1c = p[:H, 1:2]                                 # (H, 1)
        b2c = p[:A, 2:3]                                 # (A, 1)

        # Layer 1: degenerate K=1 matmul -> VPU outer product, fully lane-dense.
        h = jnp.maximum(w1c * x + b1c, 0.0)              # (H, TBL)

        # Layer 2: A tiny -> unrolled VPU broadcast-MACs + sublane reduces (no MXU needed).
        logits = jnp.concatenate(
            [jnp.sum(p[:H, 8 + a:9 + a] * h, axis=0, keepdims=True) for a in range(A)],
            axis=0) + b2c                                # (A, TBL)

        # Numerically stable softmax over the action (sublane) axis; exact normalization.
        m = jnp.max(logits, axis=0, keepdims=True)       # (1, TBL)
        e = jnp.exp(logits - m)                          # (A, TBL)
        denom = jnp.sum(e, axis=0, keepdims=True)        # (1, TBL)
        out_ref[...] = e / denom

    return policy_kernel


def pack_params(w1, b1, w2, b2):
    """Pack (1,H), (1,H), (H,A), (1,A) params into one lane-dense (Rp, 128) f32 buffer."""
    H, A = w2.shape
    assert 8 + A <= 128, "packing assumes num_actions <= 120"
    assert H <= 128, "packing assumes hidden_size <= 128"
    Rp = ((max(H, A, 8) + 7) // 8) * 8
    p = jnp.zeros((Rp, 128), jnp.float32)
    p = p.at[:H, 0].set(w1.reshape(H))
    p = p.at[:H, 1].set(b1.reshape(H))
    p = p.at[:A, 2].set(b2.reshape(A))
    p = p.at[:H, 8:8 + A].set(w2)
    return p


@functools.partial(jax.jit, static_argnames=("hidden_size", "num_actions", "block_lanes"))
def policy_network(state, packed_params, *, hidden_size, num_actions, block_lanes=32768):
    """state: (B, 1) f32; packed_params: (Rp, 128) f32 -> action probs (B, A) f32."""
    B = state.shape[0]
    H, A = hidden_size, num_actions
    Rp = packed_params.shape[0]

    # --- batch-on-lanes tiling -------------------------------------------------------------
    n_chunks = pl.cdiv(B, 128)                    # number of 128-lane batch chunks
    target_chunks = max(1, block_lanes // 128)    # ~32K batch elements per grid step
    steps = max(1, pl.cdiv(n_chunks, target_chunks))
    if n_chunks >= 2:
        steps = max(steps, 2)                     # v7x megacore: give both TCs work
    chunks_per_step = pl.cdiv(n_chunks, steps)
    TBL = chunks_per_step * 128                   # lanes per grid step (multiple of 128)
    Bp = TBL * steps                              # padded batch

    flat = state.reshape(-1).astype(jnp.float32)  # (B,)
    state_t = jnp.pad(flat, (0, Bp - B)).reshape(1, Bp)

    kernel = make_policy_kernel(H, A)
    probs_t = pl.pallas_call(
        kernel,
        out_shape=jax.ShapeDtypeStruct((A, Bp), jnp.float32),
        grid_spec=pltpu.PrefetchScalarGridSpec(
            num_scalar_prefetch=0,
            grid=(steps,),
            in_specs=[
                pl.BlockSpec((1, TBL), lambda i: (0, i)),    # state chunk (lane-dense)
                pl.BlockSpec((Rp, 128), lambda i: (0, 0)),   # packed params, resident
            ],
            out_specs=pl.BlockSpec((A, TBL), lambda i: (0, i)),  # lane-dense output slab
        ),
        compiler_params=pltpu.CompilerParams(
            dimension_semantics=("parallel",),
            vmem_limit_bytes=32 * 1024 * 1024,
        ),
    )(state_t, packed_params)

    # Un-pad and put the batch back on the leading axis (cheap XLA transpose in the wrapper).
    return probs_t[:, :B].T
    # TODO(synk): optionally fuse downstream categorical/Gumbel action sampling
    # (pltpu.prng_seed + pltpu.prng_random_bits) into this call to amortize launch overhead.


def init_params(key, hidden_size=32, num_actions=3):
    """Deterministic synthetic init mirroring nn.Linear shapes (stored as (in, out))."""
    k1, k2, k3, k4 = jax.random.split(key, 4)
    bound1 = 1.0                          # 1/sqrt(in_features=1)
    bound2 = 1.0 / jnp.sqrt(hidden_size)
    w1 = jax.random.uniform(k1, (1, hidden_size), jnp.float32, -bound1, bound1)
    b1 = jax.random.uniform(k2, (1, hidden_size), jnp.float32, -bound1, bound1)
    w2 = jax.random.uniform(k3, (hidden_size, num_actions), jnp.float32, -bound2, bound2)
    b2 = jax.random.uniform(k4, (1, num_actions), jnp.float32, -bound2, bound2)
    return w1, b1, w2, b2


if __name__ == "__main__":
    key = jax.random.PRNGKey(0)
    k_state, k_params = jax.random.split(key)

    batch = 8
    hidden_size = 32
    num_actions = 3

    state = jax.random.normal(k_state, (batch, 1), dtype=jnp.float32)
    w1, b1, w2, b2 = init_params(k_params, hidden_size, num_actions)
    packed = pack_params(w1, b1, w2, b2)

    probs = policy_network(state, packed, hidden_size=hidden_size, num_actions=num_actions)
    probs = jax.block_until_ready(probs)

    # Reference in plain JAX (second matmul at HIGHEST precision so both paths are exact f32).
    h_ref = jnp.maximum(state @ w1 + b1, 0.0)
    logits_ref = jnp.dot(h_ref, w2, precision=jax.lax.Precision.HIGHEST) + b2
    ref = jax.nn.softmax(logits_ref, axis=-1)

    assert probs.shape == (batch, num_actions)
    assert jnp.allclose(probs, ref, atol=1e-4), "mismatch vs reference"
    assert jnp.allclose(jnp.sum(probs, axis=-1), 1.0, atol=1e-4)

    print("KERNEL_OK")
</pallas_src>

<mosaic_0001>
module attributes {stable_mosaic.version = 11 : i64} {
  func.func @policy_kernel(%arg0: i32, %arg1: memref<1x128xf32, #tpu.memory_space<vmem>>, %arg2: memref<32x128xf32, #tpu.memory_space<vmem>>, %arg3: memref<3x128xf32, #tpu.memory_space<vmem>>) attributes {dimension_semantics = [#tpu.dimension_semantics<parallel>], iteration_bounds = array<i64: 1>, scalar_prefetch = 0 : i64, scratch_operands = 0 : i64, tpu.core_type = #tpu.core_type<tc>, window_params = [{transform_indices = @transform_0, window_bounds = array<i64: 1, 128>}, {pipeline_mode = #tpu.pipeline_mode<synchronous>, transform_indices = @transform_1, window_bounds = array<i64: 32, 128>}, {transform_indices = @transform_2, window_bounds = array<i64: 3, 128>}]} {
    %c0 = arith.constant 0 : index
    %c0_0 = arith.constant 0 : index
    %0 = vector.load %arg1[%c0, %c0_0] : memref<1x128xf32, #tpu.memory_space<vmem>>, vector<1x128xf32>
    %c0_1 = arith.constant 0 : index
    %c0_2 = arith.constant 0 : index
    %1 = vector.load %arg2[%c0_1, %c0_2] : memref<32x128xf32, #tpu.memory_space<vmem>>, vector<32x128xf32>
    %2 = vector.extract_strided_slice %1 {offsets = [0, 0], sizes = [32, 1], strides = [1, 1]} : vector<32x128xf32> to vector<32x1xf32>
    %3 = vector.extract_strided_slice %1 {offsets = [0, 1], sizes = [32, 1], strides = [1, 1]} : vector<32x128xf32> to vector<32x1xf32>
    %4 = vector.extract_strided_slice %1 {offsets = [0, 2], sizes = [3, 1], strides = [1, 1]} : vector<32x128xf32> to vector<3x1xf32>
    %5 = vector.broadcast %2 : vector<32x1xf32> to vector<32x128xf32>
    %6 = vector.broadcast %0 : vector<1x128xf32> to vector<32x128xf32>
    %7 = arith.mulf %5, %6 : vector<32x128xf32>
    %8 = vector.broadcast %3 : vector<32x1xf32> to vector<32x128xf32>
    %9 = arith.addf %7, %8 : vector<32x128xf32>
    %cst = arith.constant 0.000000e+00 : f32
    %10 = vector.broadcast %cst : f32 to vector<32x128xf32>
    %11 = arith.maximumf %9, %10 : vector<32x128xf32>
    %12 = vector.extract_strided_slice %1 {offsets = [0, 8], sizes = [32, 1], strides = [1, 1]} : vector<32x128xf32> to vector<32x1xf32>
    %13 = vector.broadcast %12 : vector<32x1xf32> to vector<32x128xf32>
    %14 = arith.mulf %13, %11 : vector<32x128xf32>
    %cst_3 = arith.constant dense<0.000000e+00> : vector<128xf32>
    %15 = vector.multi_reduction <add>, %14, %cst_3 [0] : vector<32x128xf32> to vector<128xf32>
    %16 = vector.shape_cast %15 : vector<128xf32> to vector<1x128xf32>
    %17 = vector.extract_strided_slice %1 {offsets = [0, 9], sizes = [32, 1], strides = [1, 1]} : vector<32x128xf32> to vector<32x1xf32>
    %18 = vector.broadcast %17 : vector<32x1xf32> to vector<32x128xf32>
    %19 = arith.mulf %18, %11 : vector<32x128xf32>
    %cst_4 = arith.constant dense<0.000000e+00> : vector<128xf32>
    %20 = vector.multi_reduction <add>, %19, %cst_4 [0] : vector<32x128xf32> to vector<128xf32>
    %21 = vector.shape_cast %20 : vector<128xf32> to vector<1x128xf32>
    %22 = vector.extract_strided_slice %1 {offsets = [0, 10], sizes = [32, 1], strides = [1, 1]} : vector<32x128xf32> to vector<32x1xf32>
    %23 = vector.broadcast %22 : vector<32x1xf32> to vector<32x128xf32>
    %24 = arith.mulf %23, %11 : vector<32x128xf32>
    %cst_5 = arith.constant dense<0.000000e+00> : vector<128xf32>
    %25 = vector.multi_reduction <add>, %24, %cst_5 [0] : vector<32x128xf32> to vector<128xf32>
    %26 = vector.shape_cast %25 : vector<128xf32> to vector<1x128xf32>
    %27 = tpu.concatenate %16, %21, %26 in 0 : vector<1x128xf32>, vector<1x128xf32>, vector<1x128xf32> -> vector<3x128xf32>
    %28 = vector.broadcast %4 : vector<3x1xf32> to vector<3x128xf32>
    %29 = arith.addf %27, %28 : vector<3x128xf32>
    %cst_6 = arith.constant dense<0xFF800000> : vector<128xf32>
    %30 = vector.multi_reduction <maximumf>, %29, %cst_6 [0] : vector<3x128xf32> to vector<128xf32>
    %31 = vector.shape_cast %30 : vector<128xf32> to vector<1x128xf32>
    %32 = vector.broadcast %31 : vector<1x128xf32> to vector<3x128xf32>
    %33 = arith.subf %29, %32 : vector<3x128xf32>
    %34 = math.exp %33 : vector<3x128xf32>
    %cst_7 = arith.constant dense<0.000000e+00> : vector<128xf32>
    %35 = vector.multi_reduction <add>, %34, %cst_7 [0] : vector<3x128xf32> to vector<128xf32>
    %36 = vector.shape_cast %35 : vector<128xf32> to vector<1x128xf32>
    %37 = vector.broadcast %36 : vector<1x128xf32> to vector<3x128xf32>
    %38 = arith.divf %34, %37 : vector<3x128xf32>
    %c0_8 = arith.constant 0 : index
    %c0_9 = arith.constant 0 : index
    %39 = vector.load %arg3[%c0_8, %c0_9] : memref<3x128xf32, #tpu.memory_space<vmem>>, vector<3x128xf32>
    tpu.vector_store %arg3[%c0_8, %c0_9], %38 {strides = array<i32>} : memref<3x128xf32, #tpu.memory_space<vmem>>, vector<3x128xf32>,
    return
  }
  func.func @transform_0(%arg0: i32) -> (i32, i32) {
    %c0_i32 = arith.constant 0 : i32
    %c0_i32_0 = arith.constant 0 : i32
    return %c0_i32, %arg0 : i32, i32
  }
  func.func @transform_1(%arg0: i32) -> (i32, i32) {
    %c0_i32 = arith.constant 0 : i32
    %c0_i32_0 = arith.constant 0 : i32
    %c0_i32_1 = arith.constant 0 : i32
    return %c0_i32, %c0_i32_0 : i32, i32
  }
  func.func @transform_2(%arg0: i32) -> (i32, i32) {
    %c0_i32 = arith.constant 0 : i32
    %c0_i32_0 = arith.constant 0 : i32
    return %c0_i32, %arg0 : i32, i32
  }
}

</mosaic_0001>

<bundles_post_ra>
// kernel: policy_network.1
= control target key start
LH: loop header
LB: loop body
LE: loop exit
PB: predicated region body
PF: predicated region fallthrough
CT: control target
= control target key end

     0   :  { %7 = vsyncpa [#allocation3], 0  ;;  %s259_s9 = smov [#allocation2]   ;;  %s292_s0 = inlined_call_operand.vmem [shape: f32[1,128], index: 0, kind: input, shape index: {}]   ;;  %s293_s1 = inlined_call_operand.hbm [shape: f32[32,128], index: 1, kind: input, shape index: {}]   ;;  %s294_s2 = inlined_call_operand.vmem [shape: f32[3,128], index: 2, kind: output, shape index: {}]  }
   0x1   :  { %s15_s10 = sshll.u32 %s259_s9, 4  ;;  %s16_s10 = int_to_ptr.vmem [resolvable:$true] %s15_s10 }
   0x2   :  { %s245_s11 = scalar_lea.vmem %s16_s10, 512  ;;  %p250_p1 = scmp.lt.s32.totalorder %s16_s10, %s16_s10 }
   0x3   :  { %p246_p0 = scmp.ne.s32.totalorder %s16_s10, %s245_s11  ;;  %p251_p2 = scmp.lt.s32.totalorder %s245_s11, %s245_s11 }
   0x5   :  { %p252_p3 = por %p251_p2, %p250_p1 }
   0x7   :  { %p253_p4 = pnand %p252_p3, %p246_p0 }
   0x9   :  { %256 = shalt.err (!%p253_p4)
}
   0xa   :  { %s260_s12 = smov 128   ;;  %s261_s13 = smov 8  }
   0xb   :  { %21 = dma.hbm_to_vmem [thread:$0]  %s293_s1, 512, %s16_s10, [#allocation3], %s260_s12, %s260_s12, %s261_s13  }
   0xc   :  { %257 = dma.done.wait [#allocation3], 512  }
   0xd   :  { %258 = vsyncadd [#allocation3], 4294966784  ;;  %v262_v0 = vmov 0   ;;  %v28_v1 = vld [vmem:[#allocation2 + $0x10] sm:$0xff]  ;;  %v26_v2 = vld [vmem:[#allocation2] sm:$0xff]  ;;  %v263_v4 = vmov 1  }
   0xe   :  { %217 = vset.pattern.permute.xlu1 %v262_v0  ;;  %216 = vset.pattern.permute.xlu0 %v262_v0  ;;  %v27_v3 = vld [vmem:[#allocation2 + $0x8] sm:$0xff]  ;;  %v29_v5 = vld [vmem:[#allocation2 + $0x18] sm:$0xff]  ;;  %v264_v6 = vmov 8   ;;  %v265_v7 = vmov 10   ;;  %v266_v8 = vmov 9   ;;  %v267_v9 = vmov 2  }
   0xf   :  { %42 = vperm.xlu1 %217, %v28_v1   ;;  %32 = vperm.xlu0 %216, %v26_v2   ;;  %v206_v20 = vld [vmem:[%s292_s0] ss:$0 sm:$0xff]  ;;  %vm171_vm0 = vcmask 1040384   ;;  %vm173_vm1 = vcmask 1041408   ;;  %vm180_vm2 = vcmask 1042432  }
  0x13   :  { %218 = vset.pattern.permute.xlu1 %v263_v4  ;;  %37 = vperm.xlu0 %216, %v27_v3  }
  0x14   :  { %61 = vperm.xlu1 %218, %v26_v2  }
  0x17   :  { %219 = vset.pattern.permute.xlu0 %v263_v4 }
  0x18   :  { %220 = vset.pattern.permute.xlu1 %v262_v0  ;;  %65 = vperm.xlu0 %219, %v27_v3  }
  0x19   :  { %47 = vperm.xlu1 %220, %v29_v5  }
  0x1c   :  { %73 = vperm.xlu0 %219, %v29_v5  }
  0x1d   :  { %221 = vset.pattern.permute.xlu1 %v263_v4 }
  0x1e   :  { %69 = vperm.xlu1 %221, %v28_v1  }
  0x20   :  { %223 = vset.pattern.permute.xlu0 %v264_v6 }
  0x21   :  { %89 = vperm.xlu0 %223, %v27_v3  }
  0x22   :  { %222 = vset.pattern.permute.xlu1 %v264_v6 }
  0x23   :  { %85 = vperm.xlu1 %222, %v26_v2  }
  0x25   :  { %225 = vset.pattern.permute.xlu0 %v265_v7 }
  0x26   :  { %143 = vperm.xlu0 %225, %v26_v2  }
  0x27   :  { %224 = vset.pattern.permute.xlu1 %v266_v8 }
  0x28   :  { %114 = vperm.xlu1 %224, %v26_v2  }
  0x2a   :  { %228 = vset.pattern.permute.xlu0 %v266_v8 }
  0x2b   :  { %122 = vperm.xlu0 %228, %v28_v1  }
  0x2c   :  { %118 = vperm.xlu1 %224, %v27_v3  }
  0x2f   :  { %126 = vperm.xlu0 %228, %v29_v5  }
  0x30   :  { %226 = vset.pattern.permute.xlu1 %v265_v7 }
  0x31   :  { %147 = vperm.xlu1 %226, %v27_v3  }
  0x33   :  { %232 = vset.pattern.permute.xlu0 %v267_v9 }
  0x34   :  { %176 = vperm.xlu0 %232, %v26_v2  }
  0x35   :  { %227 = vset.pattern.permute.xlu1 %v264_v6 }
  0x36   :  { %93 = vperm.xlu1 %227, %v28_v1  }
  0x3a   :  { %229 = vset.pattern.permute.xlu1 %v265_v7 }
  0x3b   :  { %151 = vperm.xlu1 %229, %v28_v1  }
  0x3f   :  { %230 = vset.pattern.permute.xlu1 %v264_v6 }
  0x40   :  { %97 = vperm.xlu1 %230, %v29_v5  }
  0x44   :  { %231 = vset.pattern.permute.xlu1 %v265_v7 }
  0x45   :  { %155 = vperm.xlu1 %231, %v29_v5  }
  0x8a   :  { %v43_v10 = vpop.permute.xlu1 %42  ;;  %v33_v11 = vpop.permute.xlu0 %32 }
  0x8b   :  { %v56_v22 = vmul.f32 %v206_v20, %v33_v11  ;;  %v58_v28 = vmul.f32 %v206_v20, %v43_v10 }
  0x8e   :  { %v38_v12 = vpop.permute.xlu0 %37 }
  0x8f   :  { %v62_v13 = vpop.permute.xlu1 %61  ;;  %v57_v21 = vmul.f32 %v206_v20, %v38_v12 }
  0x90   :  { %v76_v26 = vadd.f32 %v62_v13, %v56_v22 }
  0x92   :  { %v80_v32 = vmax.f32 %v76_v26, 0.0 }
  0x93   :  { %v66_v14 = vpop.permute.xlu0 %65 }
  0x94   :  { %v48_v15 = vpop.permute.xlu1 %47  ;;  %v77_v25 = vadd.f32 %v66_v14, %v57_v21 }
  0x95   :  { %v59_v30 = vmul.f32 %v206_v20, %v48_v15 }
  0x96   :  { %v81_v29 = vmax.f32 %v77_v25, 0.0 }
  0x97   :  { %v74_v16 = vpop.permute.xlu0 %73 }
  0x98   :  { %v79_v35 = vadd.f32 %v74_v16, %v59_v30 }
  0x99   :  { %v70_v17 = vpop.permute.xlu1 %69 }
  0x9a   :  { %v78_v33 = vadd.f32 %v70_v17, %v58_v28  ;;  %v83_v41 = vmax.f32 %v79_v35, 0.0 }
  0x9c   :  { %v90_v18 = vpop.permute.xlu0 %89  ;;  %v82_v38 = vmax.f32 %v78_v33, 0.0 }
  0x9d   :  { %v101_v46 = vmul.f32 %v90_v18, %v81_v29 }
  0x9e   :  { %v86_v19 = vpop.permute.xlu1 %85 }
  0x9f   :  { %v100_v47 = vmul.f32 %v86_v19, %v80_v32 }
  0xa1   :  { %v144_v23 = vpop.permute.xlu0 %143  ;;  %v104_v51 = vadd.f32 %v101_v46, %v100_v47 }
  0xa2   :  { %v158_v57 = vmul.f32 %v144_v23, %v80_v32 }
  0xa3   :  { %v115_v24 = vpop.permute.xlu1 %114 }
  0xa4   :  { %v129_v36 = vmul.f32 %v115_v24, %v80_v32 }
  0xa6   :  { %v123_v31 = vpop.permute.xlu0 %122 }
  0xa7   :  { %v119_v27 = vpop.permute.xlu1 %118  ;;  %v131_v42 = vmul.f32 %v123_v31, %v82_v38 }
  0xa8   :  { %v130_v34 = vmul.f32 %v119_v27, %v81_v29 }
  0xaa   :  { %v133_v39 = vadd.f32 %v130_v34, %v129_v36  ;;  %v127_v40 = vpop.permute.xlu0 %126 }
  0xab   :  { %v132_v44 = vmul.f32 %v127_v40, %v83_v41 }
  0xac   :  { %v148_v37 = vpop.permute.xlu1 %147  ;;  %v134_v45 = vadd.f32 %v133_v39, %v131_v42 }
  0xad   :  { %v159_v53 = vmul.f32 %v148_v37, %v81_v29 }
  0xae   :  { %v135_v48 = vadd.f32 %v134_v45, %v132_v44 }
  0xaf   :  { %v162_v61 = vadd.f32 %v159_v53, %v158_v57  ;;  %v177_v17 = vpop.permute.xlu0 %176 }
  0xb0   :  { %v136_v52 = vrot.slane %v135_v48, 4 }
  0xb1   :  { %v94_v43 = vpop.permute.xlu1 %93 }
  0xb2   :  { %v102_v50 = vmul.f32 %v94_v43, %v82_v38  ;;  %v137_v59 = vadd.f32 %v136_v52, %v135_v48 }
  0xb4   :  { %v105_v55 = vadd.f32 %v104_v51, %v102_v50  ;;  %v138_v2 = vrot.slane %v137_v59, 2 }
  0xb6   :  { %v152_v49 = vpop.permute.xlu1 %151  ;;  %v139_v7 = vadd.f32 %v138_v2, %v137_v59 }
  0xb7   :  { %v160_v58 = vmul.f32 %v152_v49, %v82_v38 }
  0xb8   :  { %v140_v12 = vrot.slane %v139_v7, 1 }
  0xb9   :  { %v163_v0 = vadd.f32 %v162_v61, %v160_v58 }
  0xba   :  { %v141_v16 = vadd.f32 %v140_v12, %v139_v7 }
  0xbb   :  { %v98_v54 = vpop.permute.xlu1 %97 }
  0xbc   :  { %v103_v56 = vmul.f32 %v98_v54, %v83_v41 }
  0xbe   :  { %v106_v60 = vadd.f32 %v105_v55, %v103_v56 }
  0xc0   :  { %v107_v62 = vrot.slane %v106_v60, 4  ;;  %v156_v63 = vpop.permute.xlu1 %155 }
  0xc1   :  { %v161_v1 = vmul.f32 %v156_v63, %v83_v41 }
  0xc2   :  { %v108_v3 = vadd.f32 %v107_v62, %v106_v60 }
  0xc3   :  { %v164_v4 = vadd.f32 %v163_v0, %v161_v1 }
  0xc4   :  { %v109_v5 = vrot.slane %v108_v3, 2 }
  0xc5   :  { %v165_v6 = vrot.slane %v164_v4, 4 }
  0xc6   :  { %v110_v8 = vadd.f32 %v109_v5, %v108_v3 }
  0xc7   :  { %v166_v9 = vadd.f32 %v165_v6, %v164_v4 }
  0xc8   :  { %v111_v10 = vrot.slane %v110_v8, 1 }
  0xc9   :  { %v167_v11 = vrot.slane %v166_v9, 2 }
  0xca   :  { %v112_v14 = vadd.f32 %v111_v10, %v110_v8 }
  0xcb   :  { %v168_v13 = vadd.f32 %v167_v11, %v166_v9 }
  0xcc   :  { %v172_v19 = vsel %vm171_vm0, %v112_v14, %v141_v16 }
  0xcd   :  { %v169_v15 = vrot.slane %v168_v13, 1 }
  0xcf   :  { %v170_v18 = vadd.f32 %v169_v15, %v168_v13 }
  0xd1   :  { %v174_v20 = vsel %vm173_vm1, %v172_v19, %v170_v18 }
  0xd2   :  { %v179_v21 = vadd.f32 %v177_v17, %v174_v20 }
  0xd4   :  { %v181_v22 = vsel %vm180_vm2, %v179_v21, -inf }
  0xd5   :  { %v182_v23 = vrot.slane %v181_v22, 4 }
  0xd7   :  { %v183_v24 = vmax.f32 %v181_v22, %v182_v23 }
  0xd9   :  { %v184_v25 = vrot.slane %v183_v24, 2 }
  0xdb   :  { %v185_v26 = vmax.f32 %v183_v24, %v184_v25 }
  0xdd   :  { %v186_v27 = vrot.slane %v185_v26, 1 }
  0xdf   :  { %v187_v28 = vmax.f32 %v185_v26, %v186_v27 }
  0xe1   :  { %v188_v29 = vsub.f32 %v179_v21, %v187_v28 }
  0xe3   :  { %v189_v30 = vmul.f32 1.442695, %v188_v29 }
  0xe5   :  { %233 = vpow2.f32 %v189_v30 }
  0xf2   :  { %v234_v31 = vpop.eup %233 }
  0xf3   :  { %v191_v32 = vsel %vm180_vm2, %v234_v31, 0.0 }
  0xf4   :  { %v192_v33 = vrot.slane %v191_v32, 4 }
  0xf6   :  { %v193_v34 = vadd.f32 %v192_v33, %v191_v32 }
  0xf8   :  { %v194_v35 = vrot.slane %v193_v34, 2 }
  0xfa   :  { %v195_v36 = vadd.f32 %v194_v35, %v193_v34 }
  0xfc   :  { %v196_v37 = vrot.slane %v195_v36, 1 }
  0xfe   :  { %v197_v38 = vadd.f32 %v196_v37, %v195_v36 }
 0x100   :  { %235 = vrcp.f32 %v197_v38 }
 0x10d   :  { %v236_v39 = vpop.eup %235 }
 0x10e   :  { %v199_v40 = vmul.f32 %v236_v39, %v234_v31 }
 0x110   :  { %200 = vst [vmem:[%s294_s2] sm:$0x7] %v199_v40 }
 0x111   :  { %205 = vsyncpa [#allocation3], 1 }

</bundles_post_ra>
